<compile_context>
chip_gen: v5e
topology: v5e:2x2
jax: 0.10.0
libtpu: 0.0.40
codegen_flags: <defaults>
</compile_context>

<pallas_src>
import math
from functools import partial

import jax
import jax.numpy as jnp
from jax.experimental import pallas as pl
from jax.experimental.pallas import tpu as pltpu


def _round_up(n, m):
    return ((n + m - 1) // m) * m


def _lora_linear_kernel(x_ref, wt_ref, b_ref, a_ref, bm_ref, o_ref, xa_ref,
                        *, scaling):
    """One (tm, tn) output tile of fused base-linear + LoRA.

    x_ref : [tm, in_f]      input row tile (resident across the N axis)
    wt_ref: [in_f, tn]      pre-transposed base weight tile
    b_ref : [1, tn]         base bias tile
    a_ref : [in_f, rank]    lora_A (full, zero-padded rank)
    bm_ref: [rank, tn]      lora_B tile (zero-padded rank rows)
    o_ref : [tm, tn]        output tile
    xa_ref: [tm, rank] f32  VMEM scratch caching scaling * (x @ lora_A)
    """
    # Compute the LoRA "down" projection once per row tile (j == 0) and reuse
    # it for every output-feature tile; fold alpha/rank into this tiny tensor.
    @pl.when(pl.program_id(1) == 0)
    def _():
        xa_ref[...] = jnp.dot(x_ref[...], a_ref[...],
                              preferred_element_type=jnp.float32) * scaling

    base = jnp.dot(x_ref[...], wt_ref[...],
                   preferred_element_type=jnp.float32)
    lora = jnp.dot(xa_ref[...], bm_ref[...],
                   preferred_element_type=jnp.float32)
    o_ref[...] = (base + b_ref[...] + lora).astype(o_ref.dtype)


def lora_linear(x, w, b, lora_a, lora_b, *, alpha, rank, tm=256, tn=256):
    """x: [..., in_f]; w: [out_f, in_f] (torch layout); returns [..., out_f]."""
    # TODO(synk): dropout with p > 0 (training mode) not implemented; p=0.0
    # default is the identity, matching eval semantics.
    scaling = alpha / rank
    in_f = x.shape[-1]
    out_f = w.shape[0]
    lead = x.shape[:-1]
    x2 = x.reshape(-1, in_f)
    m = x2.shape[0]
    dtype = x.dtype

    # Hardware-friendly padded sizes: lane axes -> multiples of 128,
    # row (sublane) axis -> multiple of 8. Tiles shrink for tiny inputs so the
    # demo does not pad 16 rows up to 256.
    tm_eff = min(tm, _round_up(m, 8))
    tn_eff = min(tn, _round_up(out_f, 128))
    m_pad = _round_up(m, tm_eff)
    out_pad = _round_up(out_f, tn_eff)
    in_pad = _round_up(in_f, 128)
    rank_pad = _round_up(rank, 128)

    # NOTE: weight-side padding / pre-transpose would normally be cached
    # outside the per-call hot path; done inline here to stay self-contained.
    x_p = jnp.zeros((m_pad, in_pad), dtype).at[:m, :in_f].set(x2)
    wt_p = jnp.zeros((in_pad, out_pad), w.dtype).at[:in_f, :out_f].set(w.T)
    b_p = jnp.zeros((1, out_pad), b.dtype).at[0, :out_f].set(b)
    a_p = jnp.zeros((in_pad, rank_pad), lora_a.dtype).at[:in_f, :rank].set(lora_a)
    bm_p = jnp.zeros((rank_pad, out_pad), lora_b.dtype).at[:rank, :out_f].set(lora_b)

    grid = (m_pad // tm_eff, out_pad // tn_eff)

    # VMEM budget derived from tile sizes (double-buffered inputs/outputs
    # plus the xa scratch), clamped to stay inside v7x's 64 MiB per-TC VMEM
    # with headroom while lifting v5e/v6e above the small scoped default.
    itemsize = jnp.dtype(dtype).itemsize
    est = (2 * (tm_eff * in_pad + in_pad * tn_eff + tn_eff
                + in_pad * rank_pad + rank_pad * tn_eff
                + tm_eff * tn_eff) * itemsize
           + tm_eff * rank_pad * 4)
    vmem_limit = int(min(max(est + (8 << 20), 32 << 20), 112 << 20))

    out = pl.pallas_call(
        partial(_lora_linear_kernel, scaling=scaling),
        out_shape=jax.ShapeDtypeStruct((m_pad, out_pad), dtype),
        grid_spec=pltpu.PrefetchScalarGridSpec(
            num_scalar_prefetch=0,
            grid=grid,
            in_specs=[
                pl.BlockSpec((tm_eff, in_pad), lambda i, j: (i, 0)),    # x
                pl.BlockSpec((in_pad, tn_eff), lambda i, j: (0, j)),    # W_t
                pl.BlockSpec((1, tn_eff), lambda i, j: (0, j)),         # bias
                pl.BlockSpec((in_pad, rank_pad), lambda i, j: (0, 0)),  # lora_A
                pl.BlockSpec((rank_pad, tn_eff), lambda i, j: (0, j)),  # lora_B
            ],
            out_specs=pl.BlockSpec((tm_eff, tn_eff), lambda i, j: (i, j)),
            scratch_shapes=[pltpu.VMEM((tm_eff, rank_pad), jnp.float32)],
        ),
        compiler_params=pltpu.CompilerParams(
            dimension_semantics=("parallel", "arbitrary"),
            vmem_limit_bytes=vmem_limit),
    )(x_p, wt_p, b_p, a_p, bm_p)

    return out[:m, :out_f].reshape(*lead, out_f)


def _init_params(key, in_features, out_features, rank):
    """Deterministic init mirroring the PyTorch module's __init__."""
    k_w, k_b, k_a = jax.random.split(key, 3)
    # nn.Linear default: U(-1/sqrt(in), 1/sqrt(in)) for weight and bias.
    bound_lin = 1.0 / math.sqrt(in_features)
    w = jax.random.uniform(k_w, (out_features, in_features), jnp.float32,
                           -bound_lin, bound_lin)
    b = jax.random.uniform(k_b, (out_features,), jnp.float32,
                           -bound_lin, bound_lin)
    # lora_A: kaiming_uniform_(a=sqrt(5)) on an (in_features, rank) tensor;
    # torch fan_in for a 2-D tensor is size(1) == rank.
    gain = math.sqrt(2.0 / (1.0 + 5.0))
    bound_a = gain * math.sqrt(3.0 / rank)
    lora_a = jax.random.uniform(k_a, (in_features, rank), jnp.float32,
                                -bound_a, bound_a)
    # lora_B: zeros (per nn.init.zeros_).
    lora_b = jnp.zeros((rank, out_features), jnp.float32)
    return w, b, lora_a, lora_b


if __name__ == "__main__":
    batch, seq, in_features, out_features, rank, alpha = 2, 8, 32, 32, 16, 16

    key = jax.random.PRNGKey(0)
    k_x, k_p, k_bt = jax.random.split(key, 3)
    x = jax.random.normal(k_x, (batch, seq, in_features), jnp.float32)
    w, b, lora_a, lora_b = _init_params(k_p, in_features, out_features, rank)

    scaling = alpha / rank

    # 1) Module-faithful init (lora_B == 0 -> LoRA path contributes zero).
    y = lora_linear(x, w, b, lora_a, lora_b, alpha=alpha, rank=rank)
    y = jax.block_until_ready(y)
    y_ref = (x @ w.T + b) + (x @ lora_a @ lora_b) * scaling
    assert y.shape == (batch, seq, out_features)
    assert jnp.allclose(y, y_ref, atol=1e-4, rtol=1e-4)

    # 2) Non-zero lora_B to exercise the LoRA path numerically.
    lora_b_nz = 0.05 * jax.random.normal(k_bt, (rank, out_features), jnp.float32)
    y2 = lora_linear(x, w, b, lora_a, lora_b_nz, alpha=alpha, rank=rank)
    y2 = jax.block_until_ready(y2)
    y2_ref = (x @ w.T + b) + (x @ lora_a @ lora_b_nz) * scaling
    assert jnp.allclose(y2, y2_ref, atol=1e-4, rtol=1e-4)

    print("KERNEL_OK")
</pallas_src>

<mosaic_0001>
module attributes {stable_mosaic.version = 11 : i64} {
  func.func @_lora_linear_kernel(%arg0: i32, %arg1: i32, %arg2: memref<16x128xf32, #tpu.memory_space<vmem>>, %arg3: memref<128x128xf32, #tpu.memory_space<vmem>>, %arg4: memref<1x128xf32, #tpu.memory_space<vmem>>, %arg5: memref<128x128xf32, #tpu.memory_space<vmem>>, %arg6: memref<128x128xf32, #tpu.memory_space<vmem>>, %arg7: memref<16x128xf32, #tpu.memory_space<vmem>>, %arg8: memref<16x128xf32, #tpu.memory_space<vmem>>) attributes {dimension_semantics = [#tpu.dimension_semantics<parallel>, #tpu.dimension_semantics<arbitrary>], iteration_bounds = array<i64: 1, 1>, scalar_prefetch = 0 : i64, scratch_operands = 1 : i64, tpu.core_type = #tpu.core_type<tc>, window_params = [{transform_indices = @transform_0, window_bounds = array<i64: 16, 128>}, {transform_indices = @transform_1, window_bounds = array<i64: 128, 128>}, {transform_indices = @transform_2, window_bounds = array<i64: 1, 128>}, {pipeline_mode = #tpu.pipeline_mode<synchronous>, transform_indices = @transform_3, window_bounds = array<i64: 128, 128>}, {transform_indices = @transform_4, window_bounds = array<i64: 128, 128>}, {transform_indices = @transform_5, window_bounds = array<i64: 16, 128>}]} {
    %c0_i32 = arith.constant 0 : i32
    %0 = arith.cmpi eq, %arg1, %c0_i32 : i32
    %1 = arith.extui %0 : i1 to i32
    %c0_i32_0 = arith.constant 0 : i32
    %2 = arith.cmpi ne, %1, %c0_i32_0 : i32
    scf.if %2 {
      %c0_13 = arith.constant 0 : index
      %c0_14 = arith.constant 0 : index
      %14 = vector.load %arg2[%c0_13, %c0_14] : memref<16x128xf32, #tpu.memory_space<vmem>>, vector<16x128xf32>
      %c0_15 = arith.constant 0 : index
      %c0_16 = arith.constant 0 : index
      %15 = vector.load %arg5[%c0_15, %c0_16] : memref<128x128xf32, #tpu.memory_space<vmem>>, vector<128x128xf32>
      %cst_17 = arith.constant dense<0.000000e+00> : vector<16x128xf32>
      %16 = tpu.matmul %14, %15, %cst_17 {dimension_numbers = #tpu.dot_dimension_numbers<[1], [0], [0], [1], [0, 0, 1, 1], [], []>} : vector<16x128xf32>, vector<128x128xf32>, vector<16x128xf32> -> vector<16x128xf32>
      %cst_18 = arith.constant 1.000000e+00 : f32
      %17 = vector.broadcast %cst_18 : f32 to vector<16x128xf32>
      %18 = arith.mulf %16, %17 : vector<16x128xf32>
      %c0_19 = arith.constant 0 : index
      %c0_20 = arith.constant 0 : index
      %19 = vector.load %arg8[%c0_19, %c0_20] : memref<16x128xf32, #tpu.memory_space<vmem>>, vector<16x128xf32>
      tpu.vector_store %arg8[%c0_19, %c0_20], %18 {strides = array<i32>} : memref<16x128xf32, #tpu.memory_space<vmem>>, vector<16x128xf32>,
    } else {
    }
    %c0 = arith.constant 0 : index
    %c0_1 = arith.constant 0 : index
    %3 = vector.load %arg2[%c0, %c0_1] : memref<16x128xf32, #tpu.memory_space<vmem>>, vector<16x128xf32>
    %c0_2 = arith.constant 0 : index
    %c0_3 = arith.constant 0 : index
    %4 = vector.load %arg3[%c0_2, %c0_3] : memref<128x128xf32, #tpu.memory_space<vmem>>, vector<128x128xf32>
    %cst = arith.constant dense<0.000000e+00> : vector<16x128xf32>
    %5 = tpu.matmul %3, %4, %cst {dimension_numbers = #tpu.dot_dimension_numbers<[1], [0], [0], [1], [0, 0, 1, 1], [], []>} : vector<16x128xf32>, vector<128x128xf32>, vector<16x128xf32> -> vector<16x128xf32>
    %c0_4 = arith.constant 0 : index
    %c0_5 = arith.constant 0 : index
    %6 = vector.load %arg8[%c0_4, %c0_5] : memref<16x128xf32, #tpu.memory_space<vmem>>, vector<16x128xf32>
    %c0_6 = arith.constant 0 : index
    %c0_7 = arith.constant 0 : index
    %7 = vector.load %arg6[%c0_6, %c0_7] : memref<128x128xf32, #tpu.memory_space<vmem>>, vector<128x128xf32>
    %cst_8 = arith.constant dense<0.000000e+00> : vector<16x128xf32>
    %8 = tpu.matmul %6, %7, %cst_8 {dimension_numbers = #tpu.dot_dimension_numbers<[1], [0], [0], [1], [0, 0, 1, 1], [], []>} : vector<16x128xf32>, vector<128x128xf32>, vector<16x128xf32> -> vector<16x128xf32>
    %c0_9 = arith.constant 0 : index
    %c0_10 = arith.constant 0 : index
    %9 = vector.load %arg4[%c0_9, %c0_10] : memref<1x128xf32, #tpu.memory_space<vmem>>, vector<1x128xf32>
    %10 = vector.broadcast %9 : vector<1x128xf32> to vector<16x128xf32>
    %11 = arith.addf %5, %10 : vector<16x128xf32>
    %12 = arith.addf %11, %8 : vector<16x128xf32>
    %c0_11 = arith.constant 0 : index
    %c0_12 = arith.constant 0 : index
    %13 = vector.load %arg7[%c0_11, %c0_12] : memref<16x128xf32, #tpu.memory_space<vmem>>, vector<16x128xf32>
    tpu.vector_store %arg7[%c0_11, %c0_12], %12 {strides = array<i32>} : memref<16x128xf32, #tpu.memory_space<vmem>>, vector<16x128xf32>,
    return
  }
  func.func @transform_0(%arg0: i32, %arg1: i32) -> (i32, i32) {
    %c0_i32 = arith.constant 0 : i32
    %c0_i32_0 = arith.constant 0 : i32
    return %arg0, %c0_i32 : i32, i32
  }
  func.func @transform_1(%arg0: i32, %arg1: i32) -> (i32, i32) {
    %c0_i32 = arith.constant 0 : i32
    %c0_i32_0 = arith.constant 0 : i32
    return %c0_i32, %arg1 : i32, i32
  }
  func.func @transform_2(%arg0: i32, %arg1: i32) -> (i32, i32) {
    %c0_i32 = arith.constant 0 : i32
    %c0_i32_0 = arith.constant 0 : i32
    return %c0_i32, %arg1 : i32, i32
  }
  func.func @transform_3(%arg0: i32, %arg1: i32) -> (i32, i32) {
    %c0_i32 = arith.constant 0 : i32
    %c0_i32_0 = arith.constant 0 : i32
    %c0_i32_1 = arith.constant 0 : i32
    return %c0_i32, %c0_i32_0 : i32, i32
  }
  func.func @transform_4(%arg0: i32, %arg1: i32) -> (i32, i32) {
    %c0_i32 = arith.constant 0 : i32
    %c0_i32_0 = arith.constant 0 : i32
    return %c0_i32, %arg1 : i32, i32
  }
  func.func @transform_5(%arg0: i32, %arg1: i32) -> (i32, i32) {
    %c0_i32 = arith.constant 0 : i32
    return %arg0, %arg1 : i32, i32
  }
}

</mosaic_0001>

<bundles_post_ra>
// kernel: tpu_custom_call.1
= control target key start
LH: loop header
LB: loop body
LE: loop exit
PB: predicated region body
PF: predicated region fallthrough
CT: control target
= control target key end

     0   :  { %10 = vsyncpa [#allocation4], 0  ;;  %s464_s0 = inlined_call_operand.hbm [shape: f32[16,128], index: 0, kind: input, shape index: {}]   ;;  %s465_s1 = inlined_call_operand.hbm [shape: f32[128,128], index: 1, kind: input, shape index: {}]   ;;  %s466_s2 = inlined_call_operand.vmem [shape: f32[1,128], index: 2, kind: input, shape index: {}]   ;;  %s467_s3 = inlined_call_operand.hbm [shape: f32[128,128], index: 3, kind: input, shape index: {}]   ;;  %s468_s4 = inlined_call_operand.hbm [shape: f32[128,128], index: 4, kind: input, shape index: {}]   ;;  %s469_s5 = inlined_call_operand.hbm [shape: f32[16,128], index: 5, kind: output, shape index: {}]  }
   0x1   :  { %11 = vsyncpa [#allocation7], 0 }
   0x2   :  { %12 = vsyncpa [#allocation10], 0 }
   0x3   :  { %13 = vsyncpa [#allocation5], 0  ;;  %s31_s20 = sshll.u32 %s465_s1, 4  ;;  %s394_s21 = smov [#allocation6]   ;;  %s32_s20 = int_to_ptr.hbm [resolvable:$true] %s31_s20 }
   0x4   :  { %s33_s22 = sshll.u32 %s394_s21, 4  ;;  %s18_s25 = sshll.u32 %s464_s0, 4  ;;  %s34_s22 = int_to_ptr.vmem [resolvable:$true] %s33_s22  ;;  %s19_s25 = int_to_ptr.hbm [resolvable:$true] %s18_s25 }
   0x5   :  { %s395_s26 = smov 128   ;;  %s396_s27 = smov 8  }
   0x6   :  { %39 = dma.hbm_to_vmem [thread:$0]  %s32_s20, 2048, %s34_s22, [#allocation7], %s395_s26, %s395_s26, %s396_s27  }
   0x7   :  { %s397_s28 = smov [#allocation3]   ;;  %s46_s1 = sshll.u32 %s467_s3, 4  ;;  %s47_s1 = int_to_ptr.hbm [resolvable:$true] %s46_s1 }
   0x8   :  { %s20_s29 = sshll.u32 %s397_s28, 4  ;;  %s59_s8 = sshll.u32 %s468_s4, 4  ;;  %s21_s29 = int_to_ptr.vmem [resolvable:$true] %s20_s29  ;;  %s60_s8 = int_to_ptr.hbm [resolvable:$true] %s59_s8 }
   0x9   :  { %26 = dma.hbm_to_vmem [thread:$0]  %s19_s25, 256, %s21_s29, [#allocation4], %s395_s26, %s395_s26, %s396_s27  }
   0xa   :  { %s398_s9 = smov [#allocation8]   ;;  %s399_s11 = smov [#allocation9]  }
   0xb   :  { %s48_s10 = sshll.u32 %s398_s9, 4  ;;  %s61_s3 = sshll.u32 %s399_s11, 4  ;;  %s49_s10 = int_to_ptr.vmem [resolvable:$true] %s48_s10  ;;  %s62_s3 = int_to_ptr.vmem [resolvable:$true] %s61_s3 }
   0xc   :  { %54 = dma.hbm_to_vmem [thread:$0]  %s47_s1, 2048, %s49_s10, [#allocation7], %s395_s26, %s395_s26, %s396_s27  }
   0xd   :  { %67 = dma.hbm_to_vmem [thread:$0]  %s60_s8, 2048, %s62_s3, [#allocation10], %s395_s26, %s395_s26, %s396_s27  }
   0xe   :  { %386 = dma.done.wait [#allocation4], 256  }
   0xf   :  { %387 = vsyncadd [#allocation4], 4294967040 }
  0x10   :  { %388 = dma.done.wait [#allocation7], 4096  }
  0x11   :  { %389 = vsyncadd [#allocation7], 4294963200 }
  0x12   :  { %390 = dma.done.wait [#allocation10], 2048  }
  0x13   :  { %391 = vsyncadd [#allocation10], 4294965248  ;;  %v105_v0 = vld [vmem:[#allocation8 + $0x78] sm:$0xff]  ;;  %v104_v1 = vld [vmem:[#allocation8 + $0x70] sm:$0xff]  ;;  %s400_s13 = smov [#allocation11]   ;;  %s227_s17 = sshll.u32 %s469_s5, 4  ;;  %s228_s17 = int_to_ptr.hbm [resolvable:$true] %s227_s17 }
  0x14   :  { %106 = vmatpush.msra.mxu0 %v105_v0  ;;  %242 = vmatpush.msra.mxu3 %v105_v0  ;;  %v103_v2 = vld [vmem:[#allocation8 + $0x68] sm:$0xff]  ;;  %v102_v3 = vld [vmem:[#allocation8 + $0x60] sm:$0xff]  ;;  %v101_v4 = vld [vmem:[#allocation8 + $0x58] sm:$0xff]  ;;  %s225_s14 = sshll.u32 %s400_s13, 4  ;;  %s226_s14 = int_to_ptr.vmem [resolvable:$true] %s225_s14 }
  0x15   :  { %v148_v5 = vld [vmem:[#allocation6 + $0x78] sm:$0xff]  ;;  %v147_v6 = vld [vmem:[#allocation6 + $0x70] sm:$0xff]  ;;  %v146_v10 = vld [vmem:[#allocation6 + $0x68] sm:$0xff] }
  0x16   :  { %107 = vmatpush.msra.mxu0 %v104_v1  ;;  %243 = vmatpush.msra.mxu3 %v104_v1  ;;  %v166_v7 = vld [vmem:[#allocation9 + $0x78] sm:$0xff]  ;;  %v100_v8 = vld [vmem:[#allocation8 + $0x50] sm:$0xff]  ;;  %v164_v11 = vld [vmem:[#allocation9 + $0x68] sm:$0xff] }
  0x17   :  { %194 = vmatpush.msra.mxu2 %v148_v5  ;;  %167 = vmatpush.msra.mxu1 %v166_v7  ;;  %v165_v9 = vld [vmem:[#allocation9 + $0x70] sm:$0xff]  ;;  %v99_v12 = vld [vmem:[#allocation8 + $0x48] sm:$0xff]  ;;  %v145_v13 = vld [vmem:[#allocation6 + $0x60] sm:$0xff] }
  0x18   :  { %108 = vmatpush.msra.mxu0 %v103_v2  ;;  %244 = vmatpush.msra.mxu3 %v103_v2  ;;  %v163_v14 = vld [vmem:[#allocation9 + $0x60] sm:$0xff]  ;;  %v144_v16 = vld [vmem:[#allocation6 + $0x58] sm:$0xff]  ;;  %v143_v19 = vld [vmem:[#allocation6 + $0x50] sm:$0xff] }
  0x19   :  { %195 = vmatpush.msra.mxu2 %v147_v6  ;;  %168 = vmatpush.msra.mxu1 %v165_v9  ;;  %v98_v15 = vld [vmem:[#allocation8 + $0x40] sm:$0xff]  ;;  %v162_v17 = vld [vmem:[#allocation9 + $0x58] sm:$0xff]  ;;  %v161_v20 = vld [vmem:[#allocation9 + $0x50] sm:$0xff] }
  0x1a   :  { %109 = vmatpush.msra.mxu0 %v102_v3  ;;  %245 = vmatpush.msra.mxu3 %v102_v3  ;;  %v97_v18 = vld [vmem:[#allocation8 + $0x38] sm:$0xff]  ;;  %v96_v21 = vld [vmem:[#allocation8 + $0x30] sm:$0xff]  ;;  %v142_v22 = vld [vmem:[#allocation6 + $0x48] sm:$0xff] }
  0x1b   :  { %196 = vmatpush.msra.mxu2 %v146_v10  ;;  %169 = vmatpush.msra.mxu1 %v164_v11  ;;  %v160_v23 = vld [vmem:[#allocation9 + $0x48] sm:$0xff]  ;;  %v141_v25 = vld [vmem:[#allocation6 + $0x40] sm:$0xff]  ;;  %v140_v28 = vld [vmem:[#allocation6 + $0x38] sm:$0xff] }
  0x1c   :  { %110 = vmatpush.msra.mxu0 %v101_v4  ;;  %246 = vmatpush.msra.mxu3 %v101_v4  ;;  %v95_v24 = vld [vmem:[#allocation8 + $0x28] sm:$0xff]  ;;  %v159_v26 = vld [vmem:[#allocation9 + $0x40] sm:$0xff]  ;;  %v158_v29 = vld [vmem:[#allocation9 + $0x38] sm:$0xff] }
  0x1d   :  { %197 = vmatpush.msra.mxu2 %v145_v13  ;;  %170 = vmatpush.msra.mxu1 %v163_v14  ;;  %v94_v27 = vld [vmem:[#allocation8 + $0x20] sm:$0xff]  ;;  %v93_v30 = vld [vmem:[#allocation8 + $0x18] sm:$0xff]  ;;  %v139_v31 = vld [vmem:[#allocation6 + $0x30] sm:$0xff] }
  0x1e   :  { %111 = vmatpush.msra.mxu0 %v100_v8  ;;  %247 = vmatpush.msra.mxu3 %v100_v8  ;;  %v157_v32 = vld [vmem:[#allocation9 + $0x30] sm:$0xff]  ;;  %v138_v34 = vld [vmem:[#allocation6 + $0x28] sm:$0xff]  ;;  %v137_v37 = vld [vmem:[#allocation6 + $0x20] sm:$0xff] }
  0x1f   :  { %198 = vmatpush.msra.mxu2 %v144_v16  ;;  %171 = vmatpush.msra.mxu1 %v162_v17  ;;  %v92_v33 = vld [vmem:[#allocation8 + $0x10] sm:$0xff]  ;;  %v156_v35 = vld [vmem:[#allocation9 + $0x28] sm:$0xff]  ;;  %v155_v38 = vld [vmem:[#allocation9 + $0x20] sm:$0xff] }
  0x20   :  { %112 = vmatpush.msra.mxu0 %v99_v12  ;;  %248 = vmatpush.msra.mxu3 %v99_v12  ;;  %v91_v36 = vld [vmem:[#allocation8 + $0x8] sm:$0xff]  ;;  %v90_v39 = vld [vmem:[#allocation8] sm:$0xff]  ;;  %v88_v40 = vld [vmem:[#allocation3] sm:$0xff] }
  0x21   :  { %199 = vmatpush.msra.mxu2 %v143_v19  ;;  %172 = vmatpush.msra.mxu1 %v161_v20  ;;  %v89_v41 = vld [vmem:[#allocation3 + $0x8] sm:$0xff]  ;;  %v135_v44 = vld [vmem:[#allocation6 + $0x10] sm:$0xff]  ;;  %v134_v46 = vld [vmem:[#allocation6 + $0x8] sm:$0xff] }
  0x22   :  { %113 = vmatpush.msra.mxu0 %v98_v15  ;;  %249 = vmatpush.msra.mxu3 %v98_v15  ;;  %v136_v42 = vld [vmem:[#allocation6 + $0x18] sm:$0xff]  ;;  %v153_v45 = vld [vmem:[#allocation9 + $0x10] sm:$0xff]  ;;  %v152_v47 = vld [vmem:[#allocation9 + $0x8] sm:$0xff] }
  0x23   :  { %200 = vmatpush.msra.mxu2 %v142_v22  ;;  %173 = vmatpush.msra.mxu1 %v160_v23  ;;  %v154_v43 = vld [vmem:[#allocation9 + $0x18] sm:$0xff]  ;;  %v133_v48 = vld [vmem:[#allocation6] sm:$0xff]  ;;  %v265_v53 = vld [vmem:[%s466_s2] ss:$0 sm:$0xff] }
  0x24   :  { %114 = vmatpush.msra.mxu0 %v97_v18  ;;  %250 = vmatpush.msra.mxu3 %v97_v18  ;;  %v151_v49 = vld [vmem:[#allocation9] sm:$0xff] }
  0x25   :  { %201 = vmatpush.msra.mxu2 %v141_v25  ;;  %174 = vmatpush.msra.mxu1 %v159_v26 }
  0x26   :  { %115 = vmatpush.msra.mxu0 %v96_v21  ;;  %251 = vmatpush.msra.mxu3 %v96_v21 }
  0x27   :  { %202 = vmatpush.msra.mxu2 %v140_v28  ;;  %175 = vmatpush.msra.mxu1 %v158_v29 }
  0x28   :  { %116 = vmatpush.msra.mxu0 %v95_v24  ;;  %252 = vmatpush.msra.mxu3 %v95_v24 }
  0x29   :  { %203 = vmatpush.msra.mxu2 %v139_v31  ;;  %176 = vmatpush.msra.mxu1 %v157_v32 }
  0x2a   :  { %117 = vmatpush.msra.mxu0 %v94_v27  ;;  %253 = vmatpush.msra.mxu3 %v94_v27 }
  0x2b   :  { %204 = vmatpush.msra.mxu2 %v138_v34  ;;  %177 = vmatpush.msra.mxu1 %v156_v35 }
  0x2c   :  { %118 = vmatpush.msra.mxu0 %v93_v30  ;;  %254 = vmatpush.msra.mxu3 %v93_v30 }
  0x2d   :  { %205 = vmatpush.msra.mxu2 %v137_v37  ;;  %178 = vmatpush.msra.mxu1 %v155_v38 }
  0x2e   :  { %119 = vmatpush.msra.mxu0 %v92_v33  ;;  %255 = vmatpush.msra.mxu3 %v92_v33 }
  0x2f   :  { %206 = vmatpush.msra.mxu2 %v136_v42  ;;  %179 = vmatpush.msra.mxu1 %v154_v43 }
  0x30   :  { %120 = vmatpush.msra.mxu0 %v91_v36  ;;  %256 = vmatpush.msra.mxu3 %v91_v36 }
  0x31   :  { %207 = vmatpush.msra.mxu2 %v135_v44  ;;  %180 = vmatpush.msra.mxu1 %v153_v45 }
  0x32   :  { %121 = vmatpush.msra.mxu0 %v90_v39  ;;  %257 = vmatpush.msra.mxu3 %v90_v39 }
  0x33   :  { %122 = vmatmul.f32.vlgmr.msra.gmra.mxu0 %v88_v40  ;;  %125 = vmatmul.f32.vlgmr.msra.gmra.mxu3 %v89_v41 }
  0x34   :  { %208 = vmatpush.msra.mxu2 %v134_v46  ;;  %181 = vmatpush.msra.mxu1 %v152_v47 }
  0x36   :  { %209 = vmatpush.msra.mxu2 %v133_v48  ;;  %182 = vmatpush.msra.mxu1 %v151_v49 }
  0x37   :  { %210 = vmatmul.f32.vlgmr.msra.gmra.mxu2 %v88_v40 }
  0x3f   :  { %213 = vmatmul.f32.gmra.mxu2 %v89_v41 }
  0xb0   :  { %v123_v50 = vpop.f32.mrf.mxu0 }
  0xb1   :  { %183 = vmatmul.f32.vlgmr.msra.gmra.mxu1 %v123_v50 }
  0xb6   :  { %v126_v51 = vpop.f32.mrf.mxu3 }
  0xb9   :  { %186 = vmatmul.f32.gmra.mxu1 %v126_v51 }
  0xba   :  { %v211_v52 = vpop.f32.mrf.mxu2 }
  0xbb   :  { %v212_v54 = vadd.f32 %v265_v53, %v211_v52 }
  0xc2   :  { %v214_v57 = vpop.f32.mrf.mxu2 }
  0xc3   :  { %v215_v58 = vadd.f32 %v265_v53, %v214_v57 }
 0x12e   :  { %v184_v55 = vpop.f32.mrf.mxu1 }
 0x12f   :  { %v217_v56 = vadd.f32 %v212_v54, %v184_v55 }
 0x131   :  { %219 = vst [vmem:[#allocation11] sm:$0xff] %v217_v56 }
 0x136   :  { %v187_v59 = vpop.f32.mrf.mxu1 }
 0x137   :  { %v218_v60 = vadd.f32 %v215_v58, %v187_v59 }
 0x139   :  { %220 = vst [vmem:[#allocation11 + $0x8] sm:$0xff] %v218_v60 }
 0x13a   :  { %233 = dma.vmem_to_hbm [thread:$0]  %s226_s14, 256, %s228_s17, [#allocation5], %s395_s26, %s395_s26, %s396_s27  }
 0x13b   :  { %392 = dma.done.wait [#allocation5], 256  }
 0x13c   :  { %393 = vsyncadd [#allocation5], 4294967040 }
 0x13d   :  { %238 = vsyncpa [#allocation4], 1 }
 0x13e   :  { %239 = vsyncpa [#allocation7], 1 }
 0x13f   :  { %240 = vsyncpa [#allocation10], 1 }
 0x140   :  { %241 = vsyncpa [#allocation5], 1 }

</bundles_post_ra>
